<compile_context>
chip_gen: v6e
topology: v6e:2x2x1
jax: 0.10.0
libtpu: 0.0.40
codegen_flags: <defaults>
</compile_context>

<pallas_src>
import jax
import jax.numpy as jnp
from jax.experimental import pallas as pl
from jax.experimental.pallas import tpu as pltpu

EPS = 1e-10


def _round_up(a: int, b: int) -> int:
    return ((a + b - 1) // b) * b


def _pack_width(d: int):
    """Return (group_width, num_groups) with group_width >= d,
    group_width * num_groups a multiple of 128, minimizing zero-padding
    (pad d up to the next divisor of 128, then fold 128/group_width rows)."""
    if d % 128 == 0:
        return d, 1
    if d < 128:
        gw = 8
        while gw < d:
            gw *= 2
        return gw, 128 // gw
    return _round_up(d, 128), 1


def _l2norm_kernel_full(x_ref, o_ref):
    """One descriptor spans the whole lane axis: lane reduce (XLU) + rsqrt (EUP)."""
    xf = x_ref[...].astype(jnp.float32)                    # f32 accumulation
    ssq = jnp.sum(xf * xf, axis=1, keepdims=True)          # (tm, 1)
    inv = jax.lax.rsqrt(ssq + EPS)                         # (tm, 1)
    o_ref[...] = (xf * inv).astype(o_ref.dtype)


def _l2norm_kernel_grouped(x_ref, bd_ref, o_ref):
    """num_groups descriptors packed per 128-lane row.

    Per-lane group sum-of-squares computed with ONE MXU matmul against a
    block-diagonal ones matrix (bd[k, j] = 1 iff lanes k and j belong to the
    same descriptor), then a single rsqrt and a single broadcast multiply.
    """
    xf = x_ref[...].astype(jnp.float32)
    x2 = xf * xf
    ssq = jnp.dot(x2, bd_ref[...], preferred_element_type=jnp.float32)  # (tm, L)
    inv = jax.lax.rsqrt(ssq + EPS)
    o_ref[...] = (xf * inv).astype(o_ref.dtype)


def l2norm(x, *, tm=None):
    """x: (N, D). Returns x with every row scaled to unit L2 norm (eps inside sqrt)."""
    N, D = x.shape
    dtype = x.dtype
    itemsize = jnp.dtype(dtype).itemsize

    group_width, num_groups = _pack_width(D)
    L = group_width * num_groups                           # kernel lane width, L % 128 == 0

    lane_pad = group_width - D
    row_pad = (-N) % num_groups                            # rows so N % num_groups == 0

    xp = x
    if lane_pad or row_pad:
        # Only for awkward widths / non-foldable row counts; zero padding is
        # norm-neutral and sliced off at the end.
        xp = jnp.pad(x, ((0, row_pad), (0, lane_pad)))
    n_rows = N + row_pad
    packed_rows = n_rows // num_groups
    if num_groups > 1:
        xp = xp.reshape(packed_rows, L)                    # free: row-major relabel

    # ---- Row tile: ~1 MiB blocks, 32-sublane aligned.  No padding to a
    # multiple of tm -- the ragged last block is masked by Pallas edge-block
    # handling (OOB reads discarded, OOB writes dropped).
    if tm is None:
        target_block_bytes = 1 << 20
        tm = max(32, min(2048, (target_block_bytes // (L * itemsize)) // 32 * 32))
    tm = _round_up(max(int(tm), 1), 32)
    if packed_rows > 64:
        # Keep >= 2 grid steps so ("parallel",) can use both v7x TensorCores.
        tm = min(tm, _round_up(pl.cdiv(packed_rows, 2), 32))
    if tm >= packed_rows:
        tm = packed_rows                                   # single full-extent block
    grid = (pl.cdiv(packed_rows, tm),)

    if num_groups == 1:
        kernel = _l2norm_kernel_full
        in_specs = [pl.BlockSpec((tm, L), lambda i: (i, 0))]
        operands = (xp,)
    else:
        ids = jnp.arange(L, dtype=jnp.int32) // group_width
        bd = (ids[:, None] == ids[None, :]).astype(jnp.float32)  # (L, L) block-diag ones
        kernel = _l2norm_kernel_grouped
        in_specs = [
            pl.BlockSpec((tm, L), lambda i: (i, 0)),
            pl.BlockSpec((L, L), lambda i: (0, 0)),        # constant block: stays resident
        ]
        operands = (xp, bd)

    out = pl.pallas_call(
        kernel,
        out_shape=jax.ShapeDtypeStruct((packed_rows, L), dtype),
        grid_spec=pltpu.PrefetchScalarGridSpec(
            num_scalar_prefetch=0,
            grid=grid,
            in_specs=in_specs,
            out_specs=pl.BlockSpec((tm, L), lambda i: (i, 0)),
        ),
        compiler_params=pltpu.CompilerParams(
            dimension_semantics=("parallel",),             # rows are fully independent
        ),
    )(*operands)

    if num_groups > 1:
        out = out.reshape(n_rows, group_width)             # free: row-major relabel
    if lane_pad or row_pad:
        out = out[:N, :D]
    return out


def l2norm_ref(x):
    # Pure-JAX reference mirroring the PyTorch forward exactly.
    norm = jnp.sqrt(jnp.sum(x * x, axis=1) + EPS)
    return x / norm[:, None]


if __name__ == "__main__":
    key = jax.random.PRNGKey(0)
    cases = [
        # (N, D, tm)
        (128, 128, None),   # HardNet descriptor width, single lane-dense block
        (300, 128, None),   # ragged row tail -> in-kernel edge masking, no pad/slice
        (256, 32, None),    # fold 4 descriptors per 128-lane row, MXU group reduction
        (300, 32, 64),      # fold + multi-step grid + ragged packed-row tail
        (40, 48, None),     # awkward width: pad 48->64, fold 2, slice back
        (2, 128, None),     # tiny batch, full-extent block
    ]
    for idx, (n, d, tm) in enumerate(cases):
        k = jax.random.fold_in(key, idx)
        x = jax.random.normal(k, (n, d), dtype=jnp.float32)

        out = l2norm(x, tm=tm)
        jax.block_until_ready(out)

        ref = l2norm_ref(x)
        assert out.shape == x.shape and out.dtype == x.dtype, (n, d, tm)
        assert jnp.allclose(out, ref, atol=1e-5, rtol=1e-5), (n, d, tm)

    print("KERNEL_OK")
</pallas_src>

<mosaic_0001>
module attributes {stable_mosaic.version = 11 : i64} {
  func.func @_l2norm_kernel_full(%arg0: i32, %arg1: memref<64x128xf32, #tpu.memory_space<vmem>>, %arg2: memref<64x128xf32, #tpu.memory_space<vmem>>) attributes {dimension_semantics = [#tpu.dimension_semantics<parallel>], iteration_bounds = array<i64: 2>, scalar_prefetch = 0 : i64, scratch_operands = 0 : i64, tpu.core_type = #tpu.core_type<tc>, window_params = [{transform_indices = @transform_0, window_bounds = array<i64: 64, 128>}, {transform_indices = @transform_1, window_bounds = array<i64: 64, 128>}]} {
    %c0 = arith.constant 0 : index
    %c0_0 = arith.constant 0 : index
    %0 = vector.load %arg1[%c0, %c0_0] : memref<64x128xf32, #tpu.memory_space<vmem>>, vector<64x128xf32>
    %1 = arith.mulf %0, %0 : vector<64x128xf32>
    %cst = arith.constant dense<0.000000e+00> : vector<64xf32>
    %2 = vector.multi_reduction <add>, %1, %cst [1] : vector<64x128xf32> to vector<64xf32>
    %3 = vector.shape_cast %2 : vector<64xf32> to vector<64x1xf32>
    %cst_1 = arith.constant 1.000000e-10 : f32
    %4 = vector.broadcast %cst_1 : f32 to vector<64x1xf32>
    %5 = arith.addf %3, %4 : vector<64x1xf32>
    %6 = math.rsqrt %5 : vector<64x1xf32>
    %7 = vector.broadcast %6 : vector<64x1xf32> to vector<64x128xf32>
    %8 = arith.mulf %0, %7 : vector<64x128xf32>
    %c0_2 = arith.constant 0 : index
    %c0_3 = arith.constant 0 : index
    %9 = vector.load %arg2[%c0_2, %c0_3] : memref<64x128xf32, #tpu.memory_space<vmem>>, vector<64x128xf32>
    tpu.vector_store %arg2[%c0_2, %c0_3], %8 {strides = array<i32>} : memref<64x128xf32, #tpu.memory_space<vmem>>, vector<64x128xf32>,
    return
  }
  func.func @transform_0(%arg0: i32) -> (i32, i32) {
    %c0_i32 = arith.constant 0 : i32
    %c0_i32_0 = arith.constant 0 : i32
    return %arg0, %c0_i32 : i32, i32
  }
  func.func @transform_1(%arg0: i32) -> (i32, i32) {
    %c0_i32 = arith.constant 0 : i32
    %c0_i32_0 = arith.constant 0 : i32
    return %arg0, %c0_i32 : i32, i32
  }
}

</mosaic_0001>

<bundles_post_ra>
// kernel: tpu_custom_call.1
= control target key start
LH: loop header
LB: loop body
LE: loop exit
PB: predicated region body
PF: predicated region fallthrough
CT: control target
= control target key end

     0   :  { %6 = vsyncpa [#allocation3], 0  ;;  %s638_s0 = inlined_call_operand.hbm [shape: f32[128,128], index: 0, kind: input, shape index: {}]   ;;  %s639_s1 = inlined_call_operand.hbm [shape: f32[128,128], index: 1, kind: output, shape index: {}]  }
   0x1   :  { %8 = vsyncpa [#allocation3 + $0x1], 0 }
   0x2   :  { %9 = vsyncpa [#allocation4], 0 }
   0x3   :  { %11 = vsyncpa [#allocation4 + $0x1], 0  ;;  %s480_s6 = smov 0   ;;  %s482_s7 = smov 0  }
   0x4   :  { %s484_s8 = smov 0   ;;  %s486_s9 = smov 0  }
   0x5 LB: > { %s501_s10 = sadd.s32 4294967295, %s462_s9   ;;  %s288_s11 = sadd.s32 4294967294, %s462_s9   ;;  %s462_s9 = sphi %s486_s9, %s654_s9   ;;  %s458_s8 = sphi %s484_s8, %s653_s8   ;;  %s454_s7 = sphi %s482_s7, %s652_s7   ;;  %s450_s6 = sphi %s480_s6, %s651_s6  }
   0x6   : > { %s505_s12 = sadd.s32 1, %s462_s9   ;;  %s24_s13 = sadd.s32 1, %s458_s8 }
   0x7   : > { %s21_s14 = ssub.s32 %s462_s9, %s505_s12  ;;  %p31_p0 = scmp.ne.s32.totalorder %s458_s8, %s454_s7 }
   0x8   : > { %p22_p1 = scmp.eq.s32.totalorder %s21_s14, 0  ;;  %p32_p2 = scmp.eq.s32.totalorder %s462_s9, 0 }
   0x9   : > { %p37_p3 = scmp.ne.s32.totalorder %s454_s7, %s450_s6  ;;  %p38_p4 = scmp.eq.s32.totalorder %s501_s10, 0 }
   0xa   : > { %s517_s15 = scalar_select %p22_p1, %s458_s8, %s24_s13  }
   0xb   : > { %p519_p5 = por %p32_p2, %p31_p0  ;;  %p523_p6 = por %p38_p4, %p37_p3 }
   0xc   : > { %p61_p7 = scmp.eq.s32.totalorder %s501_s10, 1  ;;  %p67_p8 = scmp.eq.s32.totalorder %s288_s11, 1 }
   0xd   : > { %s643_s17 = scalar_select %p523_p6, 1, 0 }
   0xe   : > { %p316_p10 = scmp.lt.s32.totalorder %s462_s9, 2  ;;  %p530_p11 = por %p61_p7, %p31_p0 }
   0xf   : > { %p534_p12 = por %p67_p8, %p37_p3  ;;  %s87_s20 = sand.u32 1, %s458_s8  }
  0x10   : > { %s644_s18 = scalar_select %p530_p11, 1, 0 }
  0x11   : > { %s645_s19 = scalar_select %p534_p12, 1, 0 }
  0x12   : > { %s302_s21 = sshll.u32 %s462_s9, 10  ;;  %s291_s22 = sshll.u32 %s87_s20, 6 }
  0x13   : > { %s543_s25 = scalar_lea.hbm %s638_s0, %s302_s21  ;;  %s91_s26 = scalar_lea.vmem [#allocation2], %s291_s22 }
  0x14   : > { %s98_s27 = sshll.u32 %s91_s26, 4  ;;  %p547_p13 = pnand %p316_p10, %p519_p5  ;;  %s551_s27 = int_to_ptr.vmem [resolvable:$true] %s98_s27 }
  0x15   : > { %s553_s29 = scalar_lea.sflag [#allocation3], %s87_s20  ;;  %s370_s30 = scalar_lea.hbm %s543_s25, 1024 }
  0x16   : > { %p371_p0 = scmp.ne.s32.totalorder %s543_s25, %s370_s30  ;;  %p372_p1 = pneg %p547_p13 }
  0x17   : > { %s375_s4 = scalar_lea.hbm %s638_s0, 2048  ;;  %p376_p4 = scmp.lt.s32.totalorder %s543_s25, %s638_s0 }
  0x18   : > { %p373_p2 = pnand %p372_p1, %p371_p0  ;;  %p377_p5 = scmp.lt.s32.totalorder %s375_s4, %s370_s30 }
  0x1a   : > { %p374_p3 = pneg %p373_p2  ;;  %p378_p7 = por %p377_p5, %p376_p4 }
  0x1c   : > { %p379_p8 = pnand %p378_p7, %p374_p3 }
  0x1e   : > { %382 = shalt.err (!%p379_p8)
}
  0x1f   : > { %s383_s13 = scalar_lea.vmem %s551_s27, 1024  ;;  %s464_s14 = smov [#allocation2]  }
  0x20   : > { %p384_p10 = scmp.ne.s32.totalorder %s551_s27, %s383_s13  ;;  %s388_s16 = sshll.u32 %s464_s14, 4  ;;  %s389_s16 = int_to_ptr.vmem [resolvable:$false] %s388_s16 }
  0x21   : > { %s390_s20 = scalar_lea.vmem %s389_s16, 2048  ;;  %p391_p2 = scmp.lt.s32.totalorder %s551_s27, %s389_s16 }
  0x22   : > { %p386_p9 = pnand %p384_p10, %p372_p1  ;;  %p392_p12 = scmp.lt.s32.totalorder %s390_s20, %s383_s13 }
  0x24   : > { %p387_p0 = pneg %p386_p9  ;;  %p393_p11 = por %p392_p12, %p391_p2 }
  0x26   : > { %p394_p6 = pnand %p393_p11, %p387_p0 }
  0x28   : > { %397 = shalt.err (!%p394_p6)
}
  0x29   : > { %s465_s21 = smov 128   ;;  %s466_s22 = smov 8  }
  0x2a   : > { %311 = dma.hbm_to_vmem [thread:$0]  (!%p547_p13), %s543_s25, 1024, %s551_s27, %s553_s29, %s465_s21, %s465_s21, %s466_s22  }
  0x2b   : > { %p294_p9 = scmp.ge.s32.totalorder %s462_s9, 1  ;;  %p106_p1 = scmp.lt.s32.totalorder %s462_s9, 3 }
  0x2d   : > { %p107_p3 = pnand %p294_p9, %p106_p1 }
  0x2e   : > { %s577_s23 = sand.u32 (!%p107_p3), 1, %s454_s7   ;;  %p647_p6 = scmp.ne.s32.totalorder (!%p107_p3), %s643_s17, 0 }
  0x2f   : > { %110 = sbr.rel (%p107_p3) target bundleno = 239 (0xef), region = 24  ;;  %s295_s24 = sshll.u32 (!%p107_p3), %s577_s23, 6 }
  0x30   : > { %s113_s26 = scalar_lea.sflag (!%p107_p3), [#allocation3], %s577_s23  ;;  %s116_s30 = scalar_lea.vmem (!%p107_p3), [#allocation2], %s295_s24 }
  0x34   : > { %441 = dma.done.wait (%p647_p6), %s113_s26, 1024  }
  0x35   : > { %443 = vsyncadd (%p647_p6), %s113_s26, 4294966272  ;;  %v139_v0 = vld [vmem:[%s116_s30 + $0x10] sm:$0xff]  ;;  %v137_v1 = vld [vmem:[%s116_s30] sm:$0xff]  ;;  %s134_s17 = scalar_lea.vmem [#allocation5], %s295_s24  ;;  %s303_s25 = sshll.u32 %s501_s10, 10 }
  0x36   : > { %v140_v2 = vld [vmem:[%s116_s30 + $0x18] sm:$0xff]  ;;  %v147_v3 = vmul.f32 %v139_v0, %v139_v0  ;;  %v145_v4 = vmul.f32 %v137_v1, %v137_v1  ;;  %v138_v5 = vld [vmem:[%s116_s30 + $0x8] sm:$0xff]  ;;  %v141_v9 = vld [vmem:[%s116_s30 + $0x20] sm:$0xff]  ;;  %s215_s27 = sshll.u32 %s134_s17, 4  ;;  %s593_s2 = scalar_lea.hbm %s639_s1, %s303_s25  ;;  %s595_s27 = int_to_ptr.vmem [resolvable:$true] %s215_s27 }
  0x37   : > { %v148_v6 = vmul.f32 %v140_v2, %v140_v2  ;;  %v146_v7 = vmul.f32 %v138_v5, %v138_v5  ;;  %v142_v8 = vld [vmem:[%s116_s30 + $0x28] sm:$0xff]  ;;  %v149_v11 = vmul.f32 %v141_v9, %v141_v9  ;;  %v144_v12 = vld [vmem:[%s116_s30 + $0x38] sm:$0xff]  ;;  %v143_v13 = vld [vmem:[%s116_s30 + $0x30] sm:$0xff]  ;;  %s202_s10 = scalar_lea.sflag [#allocation4], %s577_s23  ;;  %s398_s3 = scalar_lea.vmem %s595_s27, 1024 }
  0x38   : > { %157 = vadd.xlane.f32.xlu1 %v147_v3  ;;  %153 = vadd.xlane.f32.xlu0 %v145_v4  ;;  %v150_v10 = vmul.f32 %v142_v8, %v142_v8  ;;  %v152_v14 = vmul.f32 %v144_v12, %v144_v12  ;;  %v151_v15 = vmul.f32 %v143_v13, %v143_v13  ;;  %p399_p11 = scmp.ne.s32.totalorder %s595_s27, %s398_s3  ;;  %p648_p12 = scmp.ne.s32.totalorder %s644_s18, 0 }
  0x39   : > { %s467_s4 = smov [#allocation5]  }
  0x3a   : > { %p400_p13 = pnand %p399_p11, %p648_p12  ;;  %s402_s5 = sshll.u32 %s467_s4, 4  ;;  %s403_s5 = int_to_ptr.vmem [resolvable:$false] %s402_s5 }
  0x3b   : > { %s404_s11 = scalar_lea.vmem %s403_s5, 2048  ;;  %p405_p5 = scmp.lt.s32.totalorder %s595_s27, %s403_s5 }
  0x3c   : > { %159 = vadd.xlane.f32.xlu1 %v148_v6  ;;  %155 = vadd.xlane.f32.xlu0 %v146_v7  ;;  %p401_p4 = pneg %p400_p13  ;;  %p406_p7 = scmp.lt.s32.totalorder %s404_s11, %s398_s3 }
  0x3e   : > { %p407_p8 = por %p406_p7, %p405_p5 }
  0x40   : > { %163 = vadd.xlane.f32.xlu1 %v150_v10  ;;  %161 = vadd.xlane.f32.xlu0 %v149_v11  ;;  %p408_p10 = pnand %p407_p8, %p401_p4 }
  0x44   : > { %167 = vadd.xlane.f32.xlu1 %v152_v14  ;;  %165 = vadd.xlane.f32.xlu0 %v151_v15 }
  0xc1   : > { %v158_v16 = vpop.xlane.xlu1 %157  ;;  %v154_v17 = vpop.xlane.xlu0 %153 }
  0xc2   : > { %v171_v18 = vadd.f32 1e-10, %v158_v16  ;;  %v169_v19 = vadd.f32 1e-10, %v154_v17 }
  0xc4   : > { %354 = vrsqrt.f32 %v171_v18 }
  0xc5   : > { %356 = vrsqrt.f32 %v169_v19  ;;  %v160_v20 = vpop.xlane.xlu1 %159  ;;  %v156_v21 = vpop.xlane.xlu0 %155 }
  0xc6   : > { %v172_v22 = vadd.f32 1e-10, %v160_v20  ;;  %v170_v23 = vadd.f32 1e-10, %v156_v21 }
  0xc8   : > { %358 = vrsqrt.f32 %v172_v22 }
  0xc9   : > { %360 = vrsqrt.f32 %v170_v23  ;;  %v164_v24 = vpop.xlane.xlu1 %163  ;;  %v162_v25 = vpop.xlane.xlu0 %161 }
  0xca   : > { %v174_v26 = vadd.f32 1e-10, %v164_v24  ;;  %v173_v27 = vadd.f32 1e-10, %v162_v25 }
  0xcc   : > { %362 = vrsqrt.f32 %v174_v26 }
  0xcd   : > { %364 = vrsqrt.f32 %v173_v27  ;;  %v168_v28 = vpop.xlane.xlu1 %167  ;;  %v166_v29 = vpop.xlane.xlu0 %165 }
  0xce   : > { %v176_v30 = vadd.f32 1e-10, %v168_v28  ;;  %v175_v31 = vadd.f32 1e-10, %v166_v29 }
  0xd0   : > { %366 = vrsqrt.f32 %v176_v30 }
  0xd1   : > { %v355_v32 = vpop.eup %354  ;;  %368 = vrsqrt.f32 %v175_v31 }
  0xd2   : > { %v357_v33 = vpop.eup %356  ;;  %v187_v34 = vmul.f32 %v355_v32, %v139_v0 }
  0xd3   : > { %v185_v35 = vmul.f32 %v357_v33, %v137_v1 }
  0xd4   : > { %195 = vst [vmem:[%s134_s17 + $0x10] sm:$0xff] %v187_v34 }
  0xd5   : > { %v359_v36 = vpop.eup %358  ;;  %193 = vst [vmem:[%s134_s17] sm:$0xff] %v185_v35 }
  0xd6   : > { %v361_v37 = vpop.eup %360  ;;  %v188_v38 = vmul.f32 %v359_v36, %v140_v2 }
  0xd7   : > { %v186_v39 = vmul.f32 %v361_v37, %v138_v5 }
  0xd8   : > { %196 = vst [vmem:[%s134_s17 + $0x18] sm:$0xff] %v188_v38 }
  0xd9   : > { %v363_v40 = vpop.eup %362  ;;  %194 = vst [vmem:[%s134_s17 + $0x8] sm:$0xff] %v186_v39 }
  0xda   : > { %v365_v41 = vpop.eup %364  ;;  %v190_v42 = vmul.f32 %v363_v40, %v142_v8 }
  0xdb   : > { %v189_v43 = vmul.f32 %v365_v41, %v141_v9 }
  0xdc   : > { %198 = vst [vmem:[%s134_s17 + $0x28] sm:$0xff] %v190_v42 }
  0xdd   : > { %v367_v44 = vpop.eup %366  ;;  %197 = vst [vmem:[%s134_s17 + $0x20] sm:$0xff] %v189_v43 }
  0xde   : > { %v369_v45 = vpop.eup %368  ;;  %v192_v46 = vmul.f32 %v367_v44, %v144_v12 }
  0xdf   : > { %v191_v47 = vmul.f32 %v369_v45, %v143_v13 }
  0xe0   : > { %200 = vst [vmem:[%s134_s17 + $0x38] sm:$0xff] %v192_v46 }
  0xe1   : > { %199 = vst [vmem:[%s134_s17 + $0x30] sm:$0xff] %v191_v47 }
  0xe2   : > { %411 = shalt.err (!%p408_p10)
}
  0xe3   : > { %s412_s13 = scalar_lea.hbm %s593_s2, 1024  ;;  %s416_s20 = scalar_lea.hbm %s639_s1, 2048 }
  0xe4   : > { %p413_p0 = scmp.ne.s32.totalorder %s593_s2, %s412_s13  ;;  %p417_p1 = scmp.lt.s32.totalorder %s593_s2, %s639_s1 }
  0xe5   : > { %p418_p3 = scmp.lt.s32.totalorder %s416_s20, %s412_s13 }
  0xe6   : > { %p414_p2 = pnand %p413_p0, %p648_p12 }
  0xe7   : > { %p419_p6 = por %p418_p3, %p417_p1 }
  0xe8   : > { %p415_p9 = pneg %p414_p2 }
  0xea   : > { %p420_p11 = pnand %p419_p6, %p415_p9 }
  0xec   : > { %423 = shalt.err (!%p420_p11)
}
  0xed   : > { %s468_s24 = smov 128   ;;  %s469_s26 = smov 8  }
  0xee   : > { %306 = dma.vmem_to_hbm [thread:$0]  (%p648_p12), %s595_s27, 1024, %s593_s2, %s202_s10, %s468_s24, %s468_s24, %s469_s26  }
  0xef PF: > { %s230_s30 = sand.u32 1, %s450_s6   ;;  %p649_p13 = scmp.ne.s32.totalorder %s645_s19, 0 }
  0xf0   : > { %p650_p4 = scmp.ge.s32.totalorder %s462_s9, 2  ;;  %s231_s17 = scalar_lea.sflag [#allocation4], %s230_s30 }
  0xf2   : > { %p313_p5 = pnand %p650_p4, %p649_p13 }
  0xf4   : > { %p314_p7 = pneg %p313_p5 }
  0xf6   : > { %445 = dma.done.wait (%p314_p7), %s231_s17, 1024  }
  0xf7   : > { %447 = vsyncadd (%p314_p7), %s231_s17, 4294966272  ;;  %p14_p8 = scmp.ge.s32.totalorder %s505_s12, 4   ;;  %s651_s6 = smov %s454_s7 }
  0xf8   : > { %s652_s7 = smov %s458_s8  ;;  %s653_s8 = smov %s517_s15 }
  0xf9   : > { %s654_s9 = smov %s505_s12  ;;  %16 = sbr.rel (!%p14_p8) target bundleno = 5 (0x5), region = 69 }
  0xfe   :  { %236 = vsyncpa [#allocation3], 1 }
  0xff   :  { %238 = vsyncpa [#allocation3 + $0x1], 1 }
 0x100   :  { %239 = vsyncpa [#allocation4], 1 }
 0x101   :  { %241 = vsyncpa [#allocation4 + $0x1], 1 }

</bundles_post_ra>
